<compile_context>
chip_gen: v7x
topology: tpu7x:2x2x1
jax: 0.10.0
libtpu: 0.0.40
codegen_flags: <defaults>
</compile_context>

<pallas_src>
import math

import jax
import jax.numpy as jnp
from jax import lax
from jax.experimental import pallas as pl
from jax.experimental.pallas import tpu as pltpu


def _round_up(x, m):
    return ((x + m - 1) // m) * m


def _make_graph_attention_kernel(chunk, num_chunks):
    """Kernel factory; chunk / num_chunks are static (trace-time) ints."""

    def kernel(lt_ref, k_ref, gt_ref, v_ref, bout_ref, out_ref):
        # lt_ref:  (C, TB)  logits, batch on the lane axis
        # k_ref:   (C, C)   K = (W_e @ W_e^T) / sqrt(d_k)   (symmetric)
        # gt_ref:  (C, C)   G^T (pre-transposed for the (j, i) layout)
        # v_ref:   (C, 1)   v = W_e @ w_out
        # bout_ref:(1,)     SMEM scalar bias of the output Linear
        # out_ref: (C, TB)  graph bias, transposed layout
        k = k_ref[...]          # (C, C)
        gT = gt_ref[...]        # (C, C)
        v = v_ref[...]          # (C, 1)
        bout = bout_ref[0]      # scalar

        def process_chunk(c):
            start = pl.multiple_of(c * chunk, chunk)
            lc = lt_ref[:, pl.ds(start, chunk)]            # (C, chunk)

            # score[j, i, b] = l[j,b] * l[i,b] * K[i,j] + G[i,j]
            # (K symmetric, gT[j,i] == G[i,j]); reduction axis j is leading,
            # so all reductions below are VALU chains over C slabs.
            score = (lc[:, None, :] * lc[None, :, :] * k[:, :, None]
                     + gT[:, :, None])                     # (C, C, chunk)

            m = jnp.max(score, axis=0)                     # (C, chunk)
            p = jnp.exp(score - m[None, :, :])             # (C, C, chunk)

            # Fold the output Linear: lv[j,b] = l[j,b]*v[j] + b_out
            # (exact because each softmax row sums to 1).
            lv = lc * v + bout                             # (C, chunk)

            # Fused softmax normalization: never materialize `atten`.
            num = jnp.sum(p * lv[:, None, :], axis=0)      # (C, chunk)
            den = jnp.sum(p, axis=0)                       # (C, chunk)
            out_ref[:, pl.ds(start, chunk)] = num / den    # exact reciprocal

        if num_chunks == 1:
            process_chunk(0)
        else:
            def body(c, carry):
                process_chunk(c)
                return carry
            lax.fori_loop(0, num_chunks, body, 0, unroll=True)

    return kernel


def graph_attention_forward(base_logits, w_e, g, w_out_weight, w_out_bias,
                            *, block_b=None, chunk=256):
    """base_logits: [B, C]; w_e: [C, d_k]; g: [C, C];
    w_out_weight: [1, d_k] (torch nn.Linear layout); w_out_bias: [1]."""
    B, C = base_logits.shape
    d_k = w_e.shape[-1]

    # --- batch tiling: lane-aligned, large enough to amortize per-step
    # overhead, but >= 2 grid steps when possible (v7x megacore sharding). ---
    b_min = _round_up(max(B, 1), 128)
    if block_b is None:
        block_b = min(2048, b_min)
    block_b = _round_up(block_b, 128)
    b_pad = _round_up(max(B, 1), block_b)
    if (b_pad // block_b) < 2 and b_pad >= 256:
        block_b = max(128, ((b_pad // 2) // 128) * 128)
        b_pad = _round_up(max(B, 1), block_b)

    # inner chunk size: multiple of 128 lanes that divides block_b
    chunk = min(chunk, block_b)
    if block_b % chunk != 0:
        chunk = 128
    num_chunks = block_b // chunk

    # --- one-time precompute (removes all MXU work from the per-batch path) ---
    w_e32 = w_e.astype(jnp.float32)
    k_mat = (w_e32 @ w_e32.T) * jnp.float32(1.0 / math.sqrt(d_k))        # (C, C)
    v_col = w_e32 @ w_out_weight.reshape(1, d_k).astype(jnp.float32).T   # (C, 1)
    bout = w_out_bias.reshape(1).astype(jnp.float32)                     # (1,)
    g_t = g.astype(jnp.float32).T                                        # (C, C) = G^T

    # Batch on the lane axis: [C, B_pad] (zero-pad extra batch columns; padded
    # columns give score == G -> finite softmax, sliced off below).
    lt = jnp.pad(base_logits.astype(jnp.float32).T, ((0, 0), (0, b_pad - B)))

    kernel = _make_graph_attention_kernel(chunk, num_chunks)

    out_t = pl.pallas_call(
        kernel,
        out_shape=jax.ShapeDtypeStruct((C, b_pad), jnp.float32),
        grid_spec=pltpu.PrefetchScalarGridSpec(
            num_scalar_prefetch=0,
            grid=(b_pad // block_b,),
            in_specs=[
                pl.BlockSpec((C, block_b), lambda b: (0, b)),   # logits tile
                pl.BlockSpec((C, C), lambda b: (0, 0)),         # K (shared)
                pl.BlockSpec((C, C), lambda b: (0, 0)),         # G^T (shared)
                pl.BlockSpec((C, 1), lambda b: (0, 0)),         # v (shared)
                pl.BlockSpec(memory_space=pltpu.MemorySpace.SMEM),  # b_out
            ],
            out_specs=pl.BlockSpec((C, block_b), lambda b: (0, b)),
        ),
        compiler_params=pltpu.CompilerParams(
            dimension_semantics=("parallel",)),
    )(lt, k_mat, g_t, v_col, bout)

    # Drop batch padding and restore [B, C] layout (cheap XLA plumbing).
    return out_t[:, :B].T


def _reference_forward(base_logits, w_e, g, w_out_weight, w_out_bias):
    # Pure-JAX reference mirroring the PyTorch module (unfactored math).
    d_k = w_e.shape[-1]
    e_img = base_logits[:, :, None] * w_e[None, :, :]
    score = jnp.einsum('bcd,bed->bce', e_img, e_img) / jnp.sqrt(
        jnp.float32(d_k))
    score = score + g[None]
    atten = jax.nn.softmax(score, axis=-1)
    aggr = jnp.einsum('bce,bed->bcd', atten, e_img)
    bias = jnp.einsum('bcd,od->bco', aggr, w_out_weight) + w_out_bias
    return bias[..., 0]


# TODO(synk): update_edge_weights_with_ground_truth operates on Python dict /
# graph-JSON structures (host-side bookkeeping, not tensor math) and has no
# Pallas equivalent; only the tensor forward() is implemented here.


if __name__ == "__main__":
    B = 2           # batch
    NUM_CLASSES = 8
    D_K = 32

    key = jax.random.PRNGKey(0)
    k_logits, k_we, k_g, k_wout, k_bout = jax.random.split(key, 5)

    base_logits = jax.random.normal(k_logits, (B, NUM_CLASSES), jnp.float32)
    # Parameters (deterministic, shapes from __init__):
    w_e = jax.random.normal(k_we, (NUM_CLASSES, D_K), jnp.float32)    # W_e
    graph_matrix = jax.random.normal(k_g, (NUM_CLASSES, NUM_CLASSES),
                                     jnp.float32)                      # G buffer
    # nn.Linear(d_k, 1): weight [1, d_k], bias [1]
    w_out_weight = jax.random.normal(k_wout, (1, D_K), jnp.float32) / math.sqrt(D_K)
    w_out_bias = jax.random.normal(k_bout, (1,), jnp.float32) / math.sqrt(D_K)

    out = graph_attention_forward(base_logits, w_e, graph_matrix,
                                  w_out_weight, w_out_bias)
    out = jax.block_until_ready(out)

    ref = _reference_forward(base_logits, w_e, graph_matrix,
                             w_out_weight, w_out_bias)
    assert out.shape == (B, NUM_CLASSES)
    # Exact reciprocal in the softmax denominator -> tight tolerance.
    assert jnp.allclose(out, ref, atol=1e-4, rtol=1e-4), (out, ref)

    print("KERNEL_OK")
</pallas_src>

<mosaic_0001>
module attributes {stable_mosaic.version = 11 : i64} {
  func.func @kernel(%arg0: i32, %arg1: memref<8x128xf32, #tpu.memory_space<vmem>>, %arg2: memref<8x8xf32, #tpu.memory_space<vmem>>, %arg3: memref<8x8xf32, #tpu.memory_space<vmem>>, %arg4: memref<8x1xf32, #tpu.memory_space<vmem>>, %arg5: memref<1xf32, #tpu.memory_space<smem>>, %arg6: memref<8x128xf32, #tpu.memory_space<vmem>>) attributes {dimension_semantics = [#tpu.dimension_semantics<parallel>], iteration_bounds = array<i64: 1>, scalar_prefetch = 0 : i64, scratch_operands = 0 : i64, tpu.core_type = #tpu.core_type<tc>, window_params = [{transform_indices = @transform_0, window_bounds = array<i64: 8, 128>}, {pipeline_mode = #tpu.pipeline_mode<synchronous>, transform_indices = @transform_1, window_bounds = array<i64: 8, 8>}, {pipeline_mode = #tpu.pipeline_mode<synchronous>, transform_indices = @transform_2, window_bounds = array<i64: 8, 8>}, {pipeline_mode = #tpu.pipeline_mode<synchronous>, transform_indices = @transform_3, window_bounds = array<i64: 8, 1>}, {transform_indices = @transform_4, window_bounds = array<i64: 1>}, {transform_indices = @transform_5, window_bounds = array<i64: 8, 128>}]} {
    %c0 = arith.constant 0 : index
    %c0_0 = arith.constant 0 : index
    %0 = vector.load %arg2[%c0, %c0_0] : memref<8x8xf32, #tpu.memory_space<vmem>>, vector<8x8xf32>
    %c0_1 = arith.constant 0 : index
    %c0_2 = arith.constant 0 : index
    %1 = vector.load %arg3[%c0_1, %c0_2] : memref<8x8xf32, #tpu.memory_space<vmem>>, vector<8x8xf32>
    %c0_3 = arith.constant 0 : index
    %c0_4 = arith.constant 0 : index
    %2 = vector.load %arg4[%c0_3, %c0_4] : memref<8x1xf32, #tpu.memory_space<vmem>>, vector<8x1xf32>
    %c0_5 = arith.constant 0 : index
    %3 = memref.load %arg5[%c0_5] : memref<1xf32, #tpu.memory_space<smem>>
    %c0_i32 = arith.constant 0 : i32
    %4 = tpu.assume_multiple %c0_i32, 128 : i32
    %c0_6 = arith.constant 0 : index
    %5 = arith.index_cast %4 : i32 to index
    %6 = vector.load %arg1[%c0_6, %5] : memref<8x128xf32, #tpu.memory_space<vmem>>, vector<8x128xf32>
    %7 = vector.shape_cast %6 : vector<8x128xf32> to vector<8x1x128xf32>
    %8 = vector.shape_cast %6 : vector<8x128xf32> to vector<1x8x128xf32>
    %9 = vector.broadcast %7 : vector<8x1x128xf32> to vector<8x8x128xf32>
    %10 = vector.broadcast %8 : vector<1x8x128xf32> to vector<8x8x128xf32>
    %11 = arith.mulf %9, %10 : vector<8x8x128xf32>
    %12 = vector.shape_cast %0 : vector<8x8xf32> to vector<8x8x1xf32>
    %13 = vector.broadcast %12 : vector<8x8x1xf32> to vector<8x8x128xf32>
    %14 = arith.mulf %11, %13 : vector<8x8x128xf32>
    %15 = vector.shape_cast %1 : vector<8x8xf32> to vector<8x8x1xf32>
    %16 = vector.broadcast %15 : vector<8x8x1xf32> to vector<8x8x128xf32>
    %17 = arith.addf %14, %16 : vector<8x8x128xf32>
    %cst = arith.constant dense<0xFF800000> : vector<8x128xf32>
    %18 = vector.multi_reduction <maximumf>, %17, %cst [0] : vector<8x8x128xf32> to vector<8x128xf32>
    %19 = vector.shape_cast %18 : vector<8x128xf32> to vector<1x8x128xf32>
    %20 = vector.broadcast %19 : vector<1x8x128xf32> to vector<8x8x128xf32>
    %21 = arith.subf %17, %20 : vector<8x8x128xf32>
    %22 = math.exp %21 : vector<8x8x128xf32>
    %23 = vector.broadcast %2 : vector<8x1xf32> to vector<8x128xf32>
    %24 = arith.mulf %6, %23 : vector<8x128xf32>
    %25 = vector.broadcast %3 : f32 to vector<8x128xf32>
    %26 = arith.addf %24, %25 : vector<8x128xf32>
    %27 = vector.shape_cast %26 : vector<8x128xf32> to vector<8x1x128xf32>
    %28 = vector.broadcast %27 : vector<8x1x128xf32> to vector<8x8x128xf32>
    %29 = arith.mulf %22, %28 : vector<8x8x128xf32>
    %cst_7 = arith.constant dense<0.000000e+00> : vector<8x128xf32>
    %30 = vector.multi_reduction <add>, %29, %cst_7 [0] : vector<8x8x128xf32> to vector<8x128xf32>
    %cst_8 = arith.constant dense<0.000000e+00> : vector<8x128xf32>
    %31 = vector.multi_reduction <add>, %22, %cst_8 [0] : vector<8x8x128xf32> to vector<8x128xf32>
    %32 = arith.divf %30, %31 : vector<8x128xf32>
    %c0_9 = arith.constant 0 : index
    %33 = arith.index_cast %4 : i32 to index
    %34 = vector.load %arg6[%c0_9, %33] : memref<8x128xf32, #tpu.memory_space<vmem>>, vector<8x128xf32>
    tpu.vector_store %arg6[%c0_9, %33], %32 {strides = array<i32>} : memref<8x128xf32, #tpu.memory_space<vmem>>, vector<8x128xf32>,
    return
  }
  func.func @transform_0(%arg0: i32) -> (i32, i32) {
    %c0_i32 = arith.constant 0 : i32
    %c0_i32_0 = arith.constant 0 : i32
    return %c0_i32, %arg0 : i32, i32
  }
  func.func @transform_1(%arg0: i32) -> (i32, i32) {
    %c0_i32 = arith.constant 0 : i32
    %c0_i32_0 = arith.constant 0 : i32
    %c0_i32_1 = arith.constant 0 : i32
    return %c0_i32, %c0_i32_0 : i32, i32
  }
  func.func @transform_2(%arg0: i32) -> (i32, i32) {
    %c0_i32 = arith.constant 0 : i32
    %c0_i32_0 = arith.constant 0 : i32
    %c0_i32_1 = arith.constant 0 : i32
    return %c0_i32, %c0_i32_0 : i32, i32
  }
  func.func @transform_3(%arg0: i32) -> (i32, i32) {
    %c0_i32 = arith.constant 0 : i32
    %c0_i32_0 = arith.constant 0 : i32
    %c0_i32_1 = arith.constant 0 : i32
    return %c0_i32, %c0_i32_0 : i32, i32
  }
  func.func @transform_4(%arg0: i32) -> i32 {
    %c0_i32 = arith.constant 0 : i32
    %c0_i32_0 = arith.constant 0 : i32
    return %c0_i32 : i32
  }
  func.func @transform_5(%arg0: i32) -> (i32, i32) {
    %c0_i32 = arith.constant 0 : i32
    %c0_i32_0 = arith.constant 0 : i32
    return %c0_i32, %arg0 : i32, i32
  }
}

</mosaic_0001>

<bundles_post_ra>
// kernel: tpu_custom_call.1
= control target key start
LH: loop header
LB: loop body
LE: loop exit
PB: predicated region body
PF: predicated region fallthrough
CT: control target
= control target key end

     0   :  { %11 = vsyncpa [#allocation4], 0  ;;  %s624_s0 = inlined_call_operand.vmem [shape: f32[8,128], index: 0, kind: input, shape index: {}]   ;;  %s625_s1 = inlined_call_operand.vmem [shape: f32[8,8], index: 1, kind: input, shape index: {}]   ;;  %s626_s2 = inlined_call_operand.hbm [shape: f32[8,8], index: 2, kind: input, shape index: {}]   ;;  %s627_s3 = inlined_call_operand.vmem [shape: f32[8,1], index: 3, kind: input, shape index: {}]   ;;  %s628_s4 = inlined_call_operand.<no memory space> [shape: f32[1], index: 4, kind: input, shape index: {}]   ;;  %s629_s5 = inlined_call_operand.hbm [shape: f32[8,128], index: 5, kind: output, shape index: {}]  }
   0x1   :  { %12 = vsyncpa [#allocation5], 0  ;;  %s506_s18 = smov [#allocation3]   ;;  %s458_s22 = scalar_lea.hbm %s626_s2, 128 }
   0x2   :  { %s23_s19 = sshll.u32 %s506_s18, 4  ;;  %p459_p0 = scmp.ne.s32.totalorder %s626_s2, %s458_s22  ;;  %s24_s19 = int_to_ptr.vmem [resolvable:$true] %s23_s19 }
   0x3   :  { %p462_p1 = scmp.lt.u32.totalorder %s458_s22, %s626_s2 }
   0x5   :  { %p464_p2 = pnand %p462_p1, %p459_p0 }
   0x7   :  { %467 = shalt.err (!%p464_p2)
}
   0x8   :  { %s468_s27 = scalar_lea.vmem %s24_s19, 128  ;;  %p473_p4 = scmp.lt.s32.totalorder %s24_s19, %s24_s19 }
   0x9   :  { %p469_p3 = scmp.ne.s32.totalorder %s24_s19, %s468_s27  ;;  %p474_p5 = scmp.lt.s32.totalorder %s468_s27, %s468_s27 }
   0xb   :  { %p475_p6 = por %p474_p5, %p473_p4 }
   0xd   :  { %p476_p7 = pnand %p475_p6, %p469_p3 }
   0xf   :  { %479 = shalt.err (!%p476_p7)
}
  0x10   :  { %26 = dma.hbm_to_vmem [thread:$0]  %s626_s2, 128, %s24_s19, [#allocation4]  }
  0x11   :  { %502 = dma.done.wait [#allocation4], 128  }
  0x12   :  { %503 = vsyncadd [#allocation4], 4294967168  ;;  %v44_v0 = vlaneseq  ;;  %v507_v1 = vmov 0   ;;  %v34_v7 = vld [vmem:[%s625_s1] sm:$0xff]  ;;  %v508_v30 = vmov 1966171168  }
  0x13   :  { %438 = vset.pattern.permute.xlu0 %v507_v1  ;;  %v35_v20 = vld [vmem:[#allocation3] sm:$0xff]  ;;  %v42_v31 = vunpack.c.l.s4 %v508_v30 }
  0x14   :  { %v45_v2 = vshrl.u32 %v44_v0, 7  ;;  %v36_v29 = vld [vmem:[%s627_s3] sm:$0xff] }
  0x15   :  { %v43_v32 = vunpack.c.0.s8 %v42_v31  ;;  %v565_v33 = vld [vmem:[%s624_s0] sm:$0xff] }
  0x16   :  { %v552_v3 = vsub.s32 0, %v45_v2  ;;  %v153_v4 = vsub.s32 2, %v45_v2  ;;  %v160_v5 = vsub.s32 3, %v45_v2  ;;  %v146_v6 = vsub.s32 1, %v45_v2 }
  0x17   :  { %v174_v12 = vsub.s32 5, %v45_v2  ;;  %v167_v13 = vsub.s32 4, %v45_v2  ;;  %v188_v16 = vsub.s32 7, %v45_v2  ;;  %v181_v17 = vsub.s32 6, %v45_v2 }
  0x18   :  { %v154_v8 = vrot.slane %v34_v7, %v153_v4  ;;  %v140_v9 = vrot.slane %v34_v7, %v552_v3  ;;  %v161_v10 = vrot.slane %v34_v7, %v160_v5  ;;  %v147_v11 = vrot.slane %v34_v7, %v146_v6 }
  0x19   :  { %v175_v14 = vrot.slane %v34_v7, %v174_v12  ;;  %v168_v15 = vrot.slane %v34_v7, %v167_v13  ;;  %v189_v18 = vrot.slane %v34_v7, %v188_v16  ;;  %v182_v19 = vrot.slane %v34_v7, %v181_v17 }
  0x1a   :  { %156 = vbcast.lane.b32.xlu1 %v154_v8, 256  ;;  %142 = vbcast.lane.b32.xlu0 %v140_v9, 256  ;;  %v211_v21 = vrot.slane %v35_v20, %v146_v6  ;;  %v204_v22 = vrot.slane %v35_v20, %v552_v3  ;;  %v225_v23 = vrot.slane %v35_v20, %v160_v5 }
  0x1b   :  { %v218_v24 = vrot.slane %v35_v20, %v153_v4  ;;  %v239_v25 = vrot.slane %v35_v20, %v174_v12  ;;  %v232_v26 = vrot.slane %v35_v20, %v167_v13  ;;  %v253_v27 = vrot.slane %v35_v20, %v188_v16 }
  0x1c   :  { %v246_v28 = vrot.slane %v35_v20, %v181_v17  ;;  %v40_v34 = vcombine.high %v565_v33, %v565_v33  ;;  %v569_v35 = vsub.s32 %v43_v32, %v45_v2 }
  0x1e   :  { %163 = vbcast.lane.b32.xlu1 %v161_v10, 256  ;;  %149 = vbcast.lane.b32.xlu0 %v147_v11, 256  ;;  %v54_v38 = vrot.slane %v40_v34, %v569_v35  ;;  %v47_v39 = vrot.slane %v565_v33, %v569_v35 }
  0x20   :  { %v55_v42 = vcombine.high %v47_v39, %v47_v39  ;;  %v56_v43 = vcombine.high %v54_v38, %v54_v38  ;;  %v63_v46 = vrot.slane %v47_v39, %v569_v35  ;;  %v70_v49 = vrot.slane %v54_v38, %v569_v35 }
  0x22   :  { %177 = vbcast.lane.b32.xlu1 %v175_v14, 256  ;;  %170 = vbcast.lane.b32.xlu0 %v168_v15, 256  ;;  %v77_v47 = vrot.slane %v55_v42, %v569_v35  ;;  %v84_v48 = vrot.slane %v56_v43, %v569_v35  ;;  %v85_v52 = vcombine.high %v63_v46, %v63_v46 }
  0x23   :  { %v108_v55 = vrot.slane %v70_v49, %v552_v3  ;;  %v86_v57 = vcombine.high %v70_v49, %v70_v49  ;;  %v92_v60 = vrot.slane %v63_v46, %v552_v3 }
  0x24   :  { %v87_v53 = vcombine.high %v77_v47, %v77_v47  ;;  %v112_v54 = vrot.slane %v84_v48, %v552_v3  ;;  %v88_v56 = vcombine.high %v84_v48, %v84_v48  ;;  %v96_v61 = vrot.slane %v77_v47, %v552_v3 }
  0x25   :  { %v100_v62 = vrot.slane %v85_v52, %v552_v3  ;;  %v133_v1 = vmul.f32 %v108_v55, %v565_v33  ;;  %v116_v4 = vrot.slane %v86_v57, %v552_v3  ;;  %v129_v7 = vmul.f32 %v92_v60, %v565_v33 }
  0x26   :  { %191 = vbcast.lane.b32.xlu1 %v189_v18, 256  ;;  %184 = vbcast.lane.b32.xlu0 %v182_v19, 256  ;;  %v104_v63 = vrot.slane %v87_v53, %v552_v3  ;;  %v134_v0 = vmul.f32 %v112_v54, %v565_v33  ;;  %v120_v2 = vrot.slane %v88_v56, %v552_v3  ;;  %v302_v54 = vstv %s628_s4  ;;  %s509_s4 = smov [#allocation6]  }
  0x27   :  { %v130_v8 = vmul.f32 %v96_v61, %v565_v33  ;;  %v131_v9 = vmul.f32 %v100_v62, %v565_v33  ;;  %v135_v14 = vmul.f32 %v116_v4, %v565_v33  ;;  %s425_s9 = sshll.u32 %s509_s4, 4  ;;  %s426_s9 = int_to_ptr.vmem [resolvable:$true] %s425_s9 }
  0x28   :  { %v132_v10 = vmul.f32 %v104_v63, %v565_v33  ;;  %v136_v13 = vmul.f32 %v120_v2, %v565_v33  ;;  %s480_s10 = scalar_lea.vmem %s426_s9, 128  ;;  %p485_p9 = scmp.lt.s32.totalorder %s426_s9, %s426_s9 }
  0x29   :  { %p481_p8 = scmp.ne.s32.totalorder %s426_s9, %s480_s10  ;;  %p486_p10 = scmp.lt.s32.totalorder %s480_s10, %s480_s10 }
  0x2a   :  { %213 = vbcast.lane.b32.xlu1 %v211_v21, 256  ;;  %206 = vbcast.lane.b32.xlu0 %v204_v22, 256 }
  0x2b   :  { %p487_p11 = por %p486_p10, %p485_p9 }
  0x2d   :  { %p488_p12 = pnand %p487_p11, %p481_p8 }
  0x2e   :  { %227 = vbcast.lane.b32.xlu1 %v225_v23, 256  ;;  %220 = vbcast.lane.b32.xlu0 %v218_v24, 256 }
  0x32   :  { %241 = vbcast.lane.b32.xlu1 %v239_v25, 256  ;;  %234 = vbcast.lane.b32.xlu0 %v232_v26, 256 }
  0x36   :  { %255 = vbcast.lane.b32.xlu1 %v253_v27, 256  ;;  %248 = vbcast.lane.b32.xlu0 %v246_v28, 256 }
  0x3a   :  { %298 = vperm.xlu0 %438, %v36_v29  }
  0x8c   :  { %v157_v36 = vpop.permute.xlu1 %156  ;;  %v143_v37 = vpop.permute.xlu0 %142 }
  0x8d   :  { %v193_v17 = vmul.f32 %v143_v37, %v129_v7  ;;  %v195_v21 = vmul.f32 %v157_v36, %v131_v9 }
  0x90   :  { %v164_v40 = vpop.permute.xlu1 %163  ;;  %v150_v41 = vpop.permute.xlu0 %149 }
  0x91   :  { %v194_v18 = vmul.f32 %v150_v41, %v130_v8  ;;  %v196_v22 = vmul.f32 %v164_v40, %v132_v10 }
  0x94   :  { %v178_v44 = vpop.permute.xlu1 %177  ;;  %v171_v45 = vpop.permute.xlu0 %170 }
  0x95   :  { %v198_v11 = vmul.f32 %v178_v44, %v134_v0  ;;  %v197_v12 = vmul.f32 %v171_v45, %v133_v1 }
  0x98   :  { %v192_v50 = vpop.permute.xlu1 %191  ;;  %v185_v51 = vpop.permute.xlu0 %184 }
  0x99   :  { %v200_v23 = vmul.f32 %v192_v50, %v136_v13  ;;  %v199_v24 = vmul.f32 %v185_v51, %v135_v14 }
  0x9c   :  { %v214_v58 = vpop.permute.xlu1 %213  ;;  %v207_v59 = vpop.permute.xlu0 %206 }
  0x9d   :  { %v258_v25 = vadd.f32 %v214_v58, %v194_v18  ;;  %v257_v26 = vadd.f32 %v207_v59, %v193_v17 }
  0xa0   :  { %v228_v5 = vpop.permute.xlu1 %227  ;;  %v221_v6 = vpop.permute.xlu0 %220 }
  0xa1   :  { %v260_v27 = vadd.f32 %v228_v5, %v196_v22  ;;  %v259_v28 = vadd.f32 %v221_v6, %v195_v21 }
  0xa4   :  { %v242_v15 = vpop.permute.xlu1 %241  ;;  %v235_v16 = vpop.permute.xlu0 %234 }
  0xa5   :  { %v262_v19 = vadd.f32 %v242_v15, %v198_v11  ;;  %v261_v20 = vadd.f32 %v235_v16, %v197_v12 }
  0xa7   :  { %v266_v31 = vmax.f32 %v258_v25, %v262_v19  ;;  %v265_v32 = vmax.f32 %v257_v26, %v261_v20 }
  0xa8   :  { %v256_v29 = vpop.permute.xlu1 %255  ;;  %v249_v30 = vpop.permute.xlu0 %248 }
  0xa9   :  { %v264_v34 = vadd.f32 %v256_v29, %v200_v23  ;;  %v263_v38 = vadd.f32 %v249_v30, %v199_v24  ;;  %v269_v37 = vmax.f32 %v265_v32, %v266_v31 }
  0xab   :  { %v268_v39 = vmax.f32 %v260_v27, %v264_v34  ;;  %v267_v42 = vmax.f32 %v259_v28, %v263_v38 }
  0xad   :  { %v270_v41 = vmax.f32 %v267_v42, %v268_v39 }
  0xaf   :  { %v271_v43 = vmax.f32 %v269_v37, %v270_v41 }
  0xb1   :  { %v272_v44 = vsub.f32 %v257_v26, %v271_v43  ;;  %v273_v36 = vsub.f32 %v258_v25, %v271_v43  ;;  %v274_v40 = vsub.f32 %v259_v28, %v271_v43  ;;  %v275_v45 = vsub.f32 %v260_v27, %v271_v43 }
  0xb2   :  { %v276_v48 = vsub.f32 %v261_v20, %v271_v43  ;;  %v277_v50 = vsub.f32 %v262_v19, %v271_v43  ;;  %v278_v52 = vsub.f32 %v263_v38, %v271_v43  ;;  %v279_v58 = vsub.f32 %v264_v34, %v271_v43 }
  0xb3   :  { %v280_v46 = vmul.f32 1.442695, %v272_v44  ;;  %v282_v47 = vmul.f32 1.442695, %v273_v36  ;;  %v284_v49 = vmul.f32 1.442695, %v274_v40 }
  0xb4   :  { %v286_v51 = vmul.f32 1.442695, %v275_v45  ;;  %v288_v53 = vmul.f32 1.442695, %v276_v48  ;;  %v290_v56 = vmul.f32 1.442695, %v277_v50 }
  0xb5   :  { %440 = vpow2.f32 %v280_v46  ;;  %v292_v59 = vmul.f32 1.442695, %v278_v52  ;;  %v294_v63 = vmul.f32 1.442695, %v279_v58 }
  0xb6   :  { %442 = vpow2.f32 %v282_v47 }
  0xb7   :  { %444 = vpow2.f32 %v284_v49 }
  0xb8   :  { %446 = vpow2.f32 %v286_v51 }
  0xb9   :  { %v299_v55 = vpop.permute.xlu0 %298  ;;  %448 = vpow2.f32 %v288_v53 }
  0xba   :  { %v301_v57 = vmul.f32 %v299_v55, %v565_v33  ;;  %450 = vpow2.f32 %v290_v56 }
  0xbb   :  { %452 = vpow2.f32 %v292_v59 }
  0xbc   :  { %v303_v60 = vadd.f32 %v302_v54, %v301_v57  ;;  %454 = vpow2.f32 %v294_v63 }
  0xbe   :  { %v305_v61 = vcombine.high %v303_v60, %v303_v60  ;;  %v312_v62 = vrot.slane %v303_v60, %v569_v35 }
  0xbf   :  { %v441_v0 = vpop.eup %440 }
  0xc0   :  { %v443_v1 = vpop.eup %442  ;;  %v319_v2 = vrot.slane %v305_v61, %v569_v35  ;;  %v320_v4 = vcombine.high %v312_v62, %v312_v62  ;;  %v328_v5 = vrot.slane %v312_v62, %v569_v35 }
  0xc1   :  { %v409_v6 = vadd.f32 %v443_v1, %v441_v0  ;;  %v445_v7 = vpop.eup %444 }
  0xc2   :  { %v321_v33 = vcombine.high %v319_v2, %v319_v2  ;;  %v342_v8 = vrot.slane %v320_v4, %v569_v35  ;;  %v350_v9 = vcombine.high %v328_v5, %v328_v5  ;;  %v357_v11 = vrot.slane %v328_v5, %v552_v3  ;;  %v447_v12 = vpop.eup %446 }
  0xc3   :  { %v410_v10 = vadd.f32 %v445_v7, %v409_v6  ;;  %v335_v13 = vrot.slane %v319_v2, %v569_v35  ;;  %v449_v18 = vpop.eup %448 }
  0xc4   :  { %v352_v14 = vcombine.high %v342_v8, %v342_v8  ;;  %v361_v15 = vrot.slane %v342_v8, %v552_v3  ;;  %v365_v17 = vrot.slane %v350_v9, %v552_v3  ;;  %v349_v19 = vrot.slane %v321_v33, %v569_v35  ;;  %v451_v24 = vpop.eup %450 }
  0xc5   :  { %v411_v16 = vadd.f32 %v447_v12, %v410_v10  ;;  %v394_v21 = vmul.f32 %v441_v0, %v357_v11  ;;  %v373_v25 = vrot.slane %v335_v13, %v552_v3  ;;  %v453_v29 = vpop.eup %452  ;;  %v351_v30 = vcombine.high %v335_v13, %v335_v13 }
  0xc6   :  { %v369_v20 = vrot.slane %v352_v14, %v552_v3  ;;  %v395_v22 = vmul.f32 %v443_v1, %v361_v15  ;;  %v396_v26 = vmul.f32 %v445_v7, %v365_v17  ;;  %v377_v31 = vrot.slane %v349_v19, %v552_v3  ;;  %v455_v39 = vpop.eup %454 }
  0xc7   :  { %v412_v23 = vadd.f32 %v449_v18, %v411_v16  ;;  %v398_v35 = vmul.f32 %v449_v18, %v373_v25  ;;  %v353_v41 = vcombine.high %v349_v19, %v349_v19  ;;  %v381_v43 = vrot.slane %v351_v30, %v552_v3 }
  0xc8   :  { %v402_v27 = vadd.f32 %v395_v22, %v394_v21  ;;  %v397_v32 = vmul.f32 %v447_v12, %v369_v20  ;;  %v399_v44 = vmul.f32 %v451_v24, %v377_v31 }
  0xc9   :  { %v413_v28 = vadd.f32 %v451_v24, %v412_v23  ;;  %v385_v45 = vrot.slane %v353_v41, %v552_v3  ;;  %v400_v46 = vmul.f32 %v453_v29, %v381_v43 }
  0xca   :  { %v403_v34 = vadd.f32 %v402_v27, %v396_v26 }
  0xcb   :  { %v414_v38 = vadd.f32 %v453_v29, %v413_v28  ;;  %v401_v48 = vmul.f32 %v455_v39, %v385_v45 }
  0xcc   :  { %v404_v42 = vadd.f32 %v403_v34, %v397_v32 }
  0xcd   :  { %v415_v37 = vadd.f32 %v455_v39, %v414_v38 }
  0xce   :  { %v405_v36 = vadd.f32 %v404_v42, %v398_v35 }
  0xcf   :  { %456 = vrcp.f32 %v415_v37 }
  0xd0   :  { %v406_v40 = vadd.f32 %v405_v36, %v399_v44 }
  0xd2   :  { %v407_v47 = vadd.f32 %v406_v40, %v400_v46 }
  0xd4   :  { %v408_v49 = vadd.f32 %v407_v47, %v401_v48 }
  0xd9   :  { %v457_v50 = vpop.eup %456 }
  0xda   :  { %v417_v51 = vmul.f32 %v457_v50, %v408_v49 }
  0xdc   :  { %418 = vst [vmem:[#allocation6] sm:$0xff] %v417_v51 }
  0xdd   :  { %491 = shalt.err (!%p488_p12)
}
  0xde   :  { %s492_s13 = scalar_lea.hbm %s629_s5, 128 }
  0xdf   :  { %p493_p13 = scmp.ne.s32.totalorder %s629_s5, %s492_s13  ;;  %p496_p0 = scmp.lt.u32.totalorder %s492_s13, %s629_s5 }
  0xe1   :  { %p498_p1 = pnand %p496_p0, %p493_p13 }
  0xe3   :  { %501 = shalt.err (!%p498_p1)
}
  0xe4   :  { %428 = dma.vmem_to_hbm [thread:$0]  %s426_s9, 128, %s629_s5, [#allocation5]  }
  0xe5   :  { %504 = dma.done.wait [#allocation5], 128  }
  0xe6   :  { %505 = vsyncadd [#allocation5], 4294967168 }
  0xe7   :  { %432 = vsyncpa [#allocation4], 1 }
  0xe8   :  { %433 = vsyncpa [#allocation5], 1 }

</bundles_post_ra>
